<compile_context>
chip_gen: v5e
topology: v5e:2x2
jax: 0.10.0
libtpu: 0.0.40
codegen_flags: <defaults>
</compile_context>

<pallas_src>
import jax
import jax.numpy as jnp
from jax import lax
from jax.experimental import pallas as pl
from jax.experimental.pallas import tpu as pltpu

# small synthetic "config"
HIDDEN_SIZE = 32
ATTENTION_HIDDEN_SIZE = 16

_MASK_NEG = -1e30  # finite large-negative additive mask


def _round_up(x, m):
    return (x + m - 1) // m * m


def _choose_batch_block(B, S, H, itemsize, target_bytes=8 << 20):
    """Batch rows per grid step, sized so the padded x block is ~target_bytes."""
    # VMEM pads the lane (last) dim to 128 and the sublane dim to 8/16/32
    # depending on dtype width; account for that padding when sizing.
    sublane = {4: 8, 2: 16, 1: 32}.get(itemsize, 8)
    plane_bytes = _round_up(S, sublane) * _round_up(H, 128) * itemsize
    bb = int(max(1, min(B, target_bytes // plane_bytes)))
    if B >= 2:
        # keep >= 2 grid steps so the "parallel" axis can use both v7x TCs
        bb = min(bb, max(1, B // 2))
    while B % bb:
        bb -= 1
    return max(bb, 1)


def _self_attention_kernel(x_ref, mask_ref, w1_ref, b1_ref, w2_ref, o_ref, s_ref):
    # x_ref:    (BB, S, H)  activations in natural layout (no HBM transpose pass)
    # mask_ref: (BB, S)     f32 mask (0/1 or fractional), lane-dense
    # w1_ref:   (A, H)      PyTorch Linear weight layout (out, in)
    # b1_ref:   (A, 1)
    # w2_ref:   (A, 1)      linear2 weight as a column
    # o_ref:    (BB, S)     attention weights, lane- and sublane-dense
    # s_ref:    (BB, S) f32 scratch holding the pre-softmax scores
    BB = x_ref.shape[0]

    w1 = w1_ref[...]
    b1 = b1_ref[...]
    w2 = w2_ref[...]

    def body(b, carry):
        x_b = x_ref[b]                                            # (S, H)
        # linear1^T on the MXU as an "NT" matmul: contract the H axis of both
        # operands -> (A, S); the sequence stays on the lane axis.
        hT = lax.dot_general(w1, x_b, (((1,), (1,)), ((), ())),
                             preferred_element_type=jnp.float32)  # (A, S)
        hT = jnp.tanh(hT + b1)                                    # EUP
        # linear2 (output width 1) as VPU multiply + sublane reduce; its bias
        # is constant along the sequence axis and cancels in the softmax.
        s_ref[pl.ds(b, 1), :] = jnp.sum(hT * w2, axis=0, keepdims=True)  # (1, S)
        return carry

    # Bounded unroll: keeps LLO scheduling visibility without exploding vreg
    # live ranges (each iteration carries an (A, S) f32 intermediate).
    lax.fori_loop(0, BB, body, 0, unroll=min(BB, 2))

    # Vectorized mask + softmax + store over the whole (BB, S) tile.
    s = s_ref[...]                                                # (BB, S)
    m = mask_ref[...]                                             # (BB, S)
    s = jnp.where(m > 0.0, s + jnp.log(jnp.maximum(m, 1e-30)), _MASK_NEG)
    mx = jnp.max(s, axis=-1, keepdims=True)                       # (BB, 1)
    e = jnp.exp(s - mx)
    denom = jnp.sum(e, axis=-1, keepdims=True)                    # (BB, 1)
    o_ref[...] = e * pl.reciprocal(denom, approx=True)


def self_attention(x, mask, w1, b1, w2, b2=None, *, batch_block=None, mxu_dtype=None):
    """x: (B, S, H), mask: (B, S) (0/1 or fractional). Returns (B, S, 1) f32.

    b2 is accepted for interface parity but unused: a bias constant along the
    sequence axis cancels exactly in the softmax.  Pass bf16 x (or set
    mxu_dtype=jnp.bfloat16) to halve HBM traffic of the dominant x stream; the
    matmul still accumulates in f32 and tanh/softmax stay f32.
    """
    B, S, H = x.shape
    A = w1.shape[0]  # PyTorch Linear weight is (out, in)

    if mxu_dtype is not None and x.dtype != mxu_dtype:
        # NOTE: a standalone cast is itself an HBM pass; for the full benefit
        # the producer of x should already emit mxu_dtype.
        x = x.astype(mxu_dtype)
    w1c = w1.astype(x.dtype)                      # (A, H), matches matmul input dtype
    b1c = b1.reshape(A, 1).astype(jnp.float32)    # (A, 1)
    w2c = w2.reshape(A, 1).astype(jnp.float32)    # (A, 1): PyTorch linear2 weight is (1, A)

    itemsize = jnp.dtype(x.dtype).itemsize
    BB = _choose_batch_block(B, S, H, itemsize) if batch_block is None else batch_block
    assert B % BB == 0, "batch_block must divide B"
    G = B // BB

    # Free metadata reshape: splitting the batch dim keeps the last two dims
    # of the mask/output blocks equal to the full array dims for any BB.
    mask_g = mask.astype(jnp.float32).reshape(G, BB, S)

    cost = pl.CostEstimate(
        flops=int(2 * B * S * A * (H + 1)),
        transcendentals=int(B * S * (A + 2)),
        bytes_accessed=int(x.size * itemsize + 2 * B * S * 4
                           + w1c.size * itemsize + 2 * A * 4),
    )

    out = pl.pallas_call(
        _self_attention_kernel,
        out_shape=jax.ShapeDtypeStruct((G, BB, S), jnp.float32),
        grid_spec=pltpu.PrefetchScalarGridSpec(
            num_scalar_prefetch=0,
            grid=(G,),
            in_specs=[
                pl.BlockSpec((BB, S, H), lambda i: (i, 0, 0)),      # x
                pl.BlockSpec((None, BB, S), lambda i: (i, 0, 0)),   # mask
                pl.BlockSpec((A, H), lambda i: (0, 0)),             # w1
                pl.BlockSpec((A, 1), lambda i: (0, 0)),             # b1
                pl.BlockSpec((A, 1), lambda i: (0, 0)),             # w2
            ],
            out_specs=pl.BlockSpec((None, BB, S), lambda i: (i, 0, 0)),
            scratch_shapes=[pltpu.VMEM((BB, S), jnp.float32)],
        ),
        compiler_params=pltpu.CompilerParams(
            dimension_semantics=("parallel",),
            vmem_limit_bytes=32 * 1024 * 1024,
        ),
        cost_estimate=cost,
    )(x, mask_g, w1c, b1c, w2c)

    return out.reshape(B, S, 1)


def self_attention_ref(x, mask, w1, b1, w2, b2):
    out = jnp.tanh(jnp.einsum("bsh,ah->bsa", x, w1) + b1)
    out = jnp.einsum("bsa,oa->bso", out, w2) + b2
    out = out + jnp.log(mask[..., None] + 1e-45)
    return jax.nn.softmax(out, axis=1)


if __name__ == "__main__":
    B, S, H, A = 2, 8, HIDDEN_SIZE, ATTENTION_HIDDEN_SIZE

    key = jax.random.PRNGKey(0)
    kx, k1, k2, k3, k4 = jax.random.split(key, 5)

    x = jax.random.normal(kx, (B, S, H), dtype=jnp.float32)
    # mask: first batch fully unmasked, second batch masks the last 3 tokens
    mask = jnp.ones((B, S), dtype=jnp.float32)
    mask = mask.at[1, S - 3:].set(0.0)

    # deterministic parameters (PyTorch Linear shapes: weight (out, in), bias (out,))
    w1 = 0.1 * jax.random.normal(k1, (A, H), dtype=jnp.float32)
    b1 = 0.1 * jax.random.normal(k2, (A,), dtype=jnp.float32)
    w2 = 0.1 * jax.random.normal(k3, (1, A), dtype=jnp.float32)
    b2 = 0.1 * jax.random.normal(k4, (1,), dtype=jnp.float32)

    # --- small correctness check (BB=1, grid=2) -----------------------------
    out = jax.block_until_ready(self_attention(x, mask, w1, b1, w2, b2))
    ref = self_attention_ref(x, mask, w1, b1, w2, b2)
    assert out.shape == (B, S, 1)
    assert jnp.allclose(out, ref, atol=1e-3, rtol=1e-2), "mismatch vs JAX reference"
    assert jnp.all(out[1, S - 3:, 0] < 1e-6)  # masked positions ~0

    # --- larger multi-batch-block path (BB=8, grid=2) + bf16 input path -----
    B2, S2 = 16, 128
    kx2, km2 = jax.random.split(jax.random.PRNGKey(1), 2)
    x2 = jax.random.normal(kx2, (B2, S2, H), dtype=jnp.float32)
    mask2 = (jax.random.uniform(km2, (B2, S2)) > 0.2).astype(jnp.float32)
    mask2 = mask2.at[:, 0].set(1.0)  # avoid fully-masked rows (degenerate case)

    out2 = jax.block_until_ready(self_attention(x2, mask2, w1, b1, w2, b2))
    ref2 = self_attention_ref(x2, mask2, w1, b1, w2, b2)
    assert jnp.allclose(out2, ref2, atol=1e-3, rtol=1e-2), "mismatch (large shape)"

    out2_bf16 = jax.block_until_ready(
        self_attention(x2, mask2, w1, b1, w2, b2, mxu_dtype=jnp.bfloat16))
    assert jnp.allclose(out2_bf16, ref2, atol=2e-3, rtol=2e-2), "mismatch (bf16 path)"

    print("KERNEL_OK")
</pallas_src>

<mosaic_0001>
module attributes {stable_mosaic.version = 11 : i64} {
  func.func @_self_attention_kernel(%arg0: i32, %arg1: memref<1x8x32xf32, #tpu.memory_space<vmem>>, %arg2: memref<1x1x8xf32, #tpu.memory_space<vmem>>, %arg3: memref<16x32xf32, #tpu.memory_space<vmem>>, %arg4: memref<16x1xf32, #tpu.memory_space<vmem>>, %arg5: memref<16x1xf32, #tpu.memory_space<vmem>>, %arg6: memref<1x1x8xf32, #tpu.memory_space<vmem>>, %arg7: memref<1x8xf32, #tpu.memory_space<vmem>>) attributes {dimension_semantics = [#tpu.dimension_semantics<parallel>], iteration_bounds = array<i64: 2>, scalar_prefetch = 0 : i64, scratch_operands = 1 : i64, tpu.core_type = #tpu.core_type<tc>, window_params = [{transform_indices = @transform_0, window_bounds = array<i64: 1, 8, 32>}, {transform_indices = @transform_1, window_bounds = array<i64: 1, 1, 8>}, {pipeline_mode = #tpu.pipeline_mode<synchronous>, transform_indices = @transform_2, window_bounds = array<i64: 16, 32>}, {pipeline_mode = #tpu.pipeline_mode<synchronous>, transform_indices = @transform_3, window_bounds = array<i64: 16, 1>}, {pipeline_mode = #tpu.pipeline_mode<synchronous>, transform_indices = @transform_4, window_bounds = array<i64: 16, 1>}, {transform_indices = @transform_5, window_bounds = array<i64: 1, 1, 8>}]} {
    %c0 = arith.constant 0 : index
    %c0_0 = arith.constant 0 : index
    %0 = vector.load %arg3[%c0, %c0_0] : memref<16x32xf32, #tpu.memory_space<vmem>>, vector<16x32xf32>
    %c0_1 = arith.constant 0 : index
    %c0_2 = arith.constant 0 : index
    %1 = vector.load %arg4[%c0_1, %c0_2] : memref<16x1xf32, #tpu.memory_space<vmem>>, vector<16x1xf32>
    %c0_3 = arith.constant 0 : index
    %c0_4 = arith.constant 0 : index
    %2 = vector.load %arg5[%c0_3, %c0_4] : memref<16x1xf32, #tpu.memory_space<vmem>>, vector<16x1xf32>
    %c0_i32 = arith.constant 0 : i32
    %3 = arith.index_cast %c0_i32 : i32 to index
    %c0_5 = arith.constant 0 : index
    %c0_6 = arith.constant 0 : index
    %4 = vector.load %arg1[%3, %c0_5, %c0_6] : memref<1x8x32xf32, #tpu.memory_space<vmem>>, vector<1x8x32xf32>
    %5 = vector.shape_cast %4 : vector<1x8x32xf32> to vector<8x32xf32>
    %cst = arith.constant dense<0.000000e+00> : vector<16x8xf32>
    %6 = tpu.matmul %0, %5, %cst {dimension_numbers = #tpu.dot_dimension_numbers<[1], [1], [0], [0], [0, 0, 1, 0], [], []>} : vector<16x32xf32>, vector<8x32xf32>, vector<16x8xf32> -> vector<16x8xf32>
    %7 = vector.broadcast %1 : vector<16x1xf32> to vector<16x8xf32>
    %8 = arith.addf %6, %7 : vector<16x8xf32>
    %9 = math.tanh %8 : vector<16x8xf32>
    %10 = vector.broadcast %2 : vector<16x1xf32> to vector<16x8xf32>
    %11 = arith.mulf %9, %10 : vector<16x8xf32>
    %cst_7 = arith.constant dense<0.000000e+00> : vector<8xf32>
    %12 = vector.multi_reduction <add>, %11, %cst_7 [0] : vector<16x8xf32> to vector<8xf32>
    %13 = vector.shape_cast %12 : vector<8xf32> to vector<1x8xf32>
    %14 = arith.index_cast %c0_i32 : i32 to index
    %c0_8 = arith.constant 0 : index
    %15 = vector.load %arg7[%14, %c0_8] : memref<1x8xf32, #tpu.memory_space<vmem>>, vector<1x8xf32>
    tpu.vector_store %arg7[%14, %c0_8], %13 {strides = array<i32>} : memref<1x8xf32, #tpu.memory_space<vmem>>, vector<1x8xf32>,
    %c1_i32 = arith.constant 1 : i32
    %c0_9 = arith.constant 0 : index
    %c0_10 = arith.constant 0 : index
    %16 = vector.load %arg7[%c0_9, %c0_10] : memref<1x8xf32, #tpu.memory_space<vmem>>, vector<1x8xf32>
    %c0_11 = arith.constant 0 : index
    %c0_12 = arith.constant 0 : index
    %c0_13 = arith.constant 0 : index
    %17 = vector.load %arg2[%c0_11, %c0_12, %c0_13] : memref<1x1x8xf32, #tpu.memory_space<vmem>>, vector<1x1x8xf32>
    %18 = vector.shape_cast %17 : vector<1x1x8xf32> to vector<1x8xf32>
    %cst_14 = arith.constant 0.000000e+00 : f32
    %19 = vector.broadcast %cst_14 : f32 to vector<1x8xf32>
    %20 = arith.cmpf ogt, %18, %19 : vector<1x8xf32>
    %cst_15 = arith.constant 1.000000e-30 : f32
    %21 = vector.broadcast %cst_15 : f32 to vector<1x8xf32>
    %22 = arith.maximumf %18, %21 : vector<1x8xf32>
    %23 = math.log %22 : vector<1x8xf32>
    %24 = arith.addf %16, %23 : vector<1x8xf32>
    %cst_16 = arith.constant -1.000000e+30 : f32
    %25 = vector.broadcast %cst_16 : f32 to vector<1x8xf32>
    %26 = arith.select %20, %24, %25 : vector<1x8xi1>, vector<1x8xf32>
    %cst_17 = arith.constant dense<0xFF800000> : vector<1xf32>
    %27 = vector.multi_reduction <maximumf>, %26, %cst_17 [1] : vector<1x8xf32> to vector<1xf32>
    %28 = vector.shape_cast %27 : vector<1xf32> to vector<1x1xf32>
    %29 = vector.broadcast %28 : vector<1x1xf32> to vector<1x8xf32>
    %30 = arith.subf %26, %29 : vector<1x8xf32>
    %31 = math.exp %30 : vector<1x8xf32>
    %cst_18 = arith.constant dense<0.000000e+00> : vector<1xf32>
    %32 = vector.multi_reduction <add>, %31, %cst_18 [1] : vector<1x8xf32> to vector<1xf32>
    %33 = vector.shape_cast %32 : vector<1xf32> to vector<1x1xf32>
    %34 = tpu.reciprocal %33 {approx = true} : vector<1x1xf32> -> vector<1x1xf32>
    %35 = vector.broadcast %34 : vector<1x1xf32> to vector<1x8xf32>
    %36 = arith.mulf %31, %35 : vector<1x8xf32>
    %c0_19 = arith.constant 0 : index
    %c0_20 = arith.constant 0 : index
    %c0_21 = arith.constant 0 : index
    %37 = vector.load %arg6[%c0_19, %c0_20, %c0_21] : memref<1x1x8xf32, #tpu.memory_space<vmem>>, vector<1x1x8xf32>
    %38 = vector.shape_cast %37 : vector<1x1x8xf32> to vector<1x8xf32>
    %39 = vector.shape_cast %36 : vector<1x8xf32> to vector<1x1x8xf32>
    tpu.vector_store %arg6[%c0_19, %c0_20, %c0_21], %39 {strides = array<i32>} : memref<1x1x8xf32, #tpu.memory_space<vmem>>, vector<1x1x8xf32>,
    return
  }
  func.func @transform_0(%arg0: i32) -> (i32, i32, i32) {
    %c0_i32 = arith.constant 0 : i32
    %c0_i32_0 = arith.constant 0 : i32
    %c0_i32_1 = arith.constant 0 : i32
    return %arg0, %c0_i32, %c0_i32_0 : i32, i32, i32
  }
  func.func @transform_1(%arg0: i32) -> (i32, i32, i32) {
    %c0_i32 = arith.constant 0 : i32
    %c0_i32_0 = arith.constant 0 : i32
    %c0_i32_1 = arith.constant 0 : i32
    return %arg0, %c0_i32, %c0_i32_0 : i32, i32, i32
  }
  func.func @transform_2(%arg0: i32) -> (i32, i32) {
    %c0_i32 = arith.constant 0 : i32
    %c0_i32_0 = arith.constant 0 : i32
    %c0_i32_1 = arith.constant 0 : i32
    return %c0_i32, %c0_i32_0 : i32, i32
  }
  func.func @transform_3(%arg0: i32) -> (i32, i32) {
    %c0_i32 = arith.constant 0 : i32
    %c0_i32_0 = arith.constant 0 : i32
    %c0_i32_1 = arith.constant 0 : i32
    return %c0_i32, %c0_i32_0 : i32, i32
  }
  func.func @transform_4(%arg0: i32) -> (i32, i32) {
    %c0_i32 = arith.constant 0 : i32
    %c0_i32_0 = arith.constant 0 : i32
    %c0_i32_1 = arith.constant 0 : i32
    return %c0_i32, %c0_i32_0 : i32, i32
  }
  func.func @transform_5(%arg0: i32) -> (i32, i32, i32) {
    %c0_i32 = arith.constant 0 : i32
    %c0_i32_0 = arith.constant 0 : i32
    %c0_i32_1 = arith.constant 0 : i32
    return %arg0, %c0_i32, %c0_i32_0 : i32, i32, i32
  }
}

</mosaic_0001>

<bundles_post_ra>
// kernel: tpu_custom_call.1
= control target key start
LH: loop header
LB: loop body
LE: loop exit
PB: predicated region body
PF: predicated region fallthrough
CT: control target
= control target key end

     0   :  { %10 = vsyncpa [#allocation4], 0  ;;  %s678_s0 = inlined_call_operand.vmem [shape: f32[2,8,32], index: 0, kind: input, shape index: {}]   ;;  %s679_s1 = inlined_call_operand.vmem [shape: f32[2,1,8], index: 1, kind: input, shape index: {}]   ;;  %s680_s2 = inlined_call_operand.vmem [shape: f32[16,32], index: 2, kind: input, shape index: {}]   ;;  %s681_s3 = inlined_call_operand.vmem [shape: f32[16,1], index: 3, kind: input, shape index: {}]   ;;  %s682_s4 = inlined_call_operand.vmem [shape: f32[16,1], index: 4, kind: input, shape index: {}]   ;;  %s683_s5 = inlined_call_operand.hbm [shape: f32[2,1,8], index: 5, kind: output, shape index: {}]  }
   0x1   :  { %12 = vsyncpa [#allocation4 + $0x1], 0  ;;  %s564_s18 = smov 0   ;;  %s566_s19 = smov 0  }
   0x2   :  { %s568_s20 = smov 0   ;;  %s570_s21 = smov 0  }
   0x3 LB: > { %s585_s22 = sadd.s32 4294967295, %s531_s21   ;;  %s406_s23 = sadd.s32 4294967294, %s531_s21   ;;  %s531_s21 = sphi %s570_s21, %s689_s21   ;;  %s527_s20 = sphi %s568_s20, %s688_s20   ;;  %s523_s19 = sphi %s566_s19, %s687_s19   ;;  %s519_s18 = sphi %s564_s18, %s686_s18  }
   0x4   : > { %s589_s24 = sadd.s32 1, %s531_s21   ;;  %s140_s25 = sadd.s32 1, %s527_s20 }
   0x5   : > { %s137_s26 = ssub.s32 %s531_s21, %s589_s24  ;;  %p150_p0 = scmp.ne.s32.totalorder %s527_s20, %s523_s19 }
   0x6   : > { %p138_p1 = scmp.eq.s32.totalorder %s137_s26, 0  ;;  %p151_p2 = scmp.eq.s32.totalorder %s585_s22, 1 }
   0x7   : > { %p156_p3 = scmp.ne.s32.totalorder %s523_s19, %s519_s18  ;;  %p157_p4 = scmp.eq.s32.totalorder %s406_s23, 1 }
   0x8   : > { %s600_s27 = scalar_select %p138_p1, %s527_s20, %s140_s25  }
   0x9   : > { %p602_p5 = por %p151_p2, %p150_p0  ;;  %p606_p6 = por %p157_p4, %p156_p3 }
   0xa   : > { %p409_p7 = scmp.ge.s32.totalorder %s531_s21, 1  ;;  %p197_p8 = scmp.lt.s32.totalorder %s531_s21, 3 }
   0xc   : > { %p198_p9 = pnand %p409_p7, %p197_p8 }
   0xd   : > { %p226_p10 = scmp.lt.s32.totalorder (!%p198_p9), %s585_s22, 1  ;;  %s338_s12 = scalar_lea.hbm (!%p198_p9), %s683_s5, %s585_s22 }
   0xe   : > { %201 = sbr.rel (%p198_p9) target bundleno = 448 (0x1c0), region = 40  ;;  %s342_s15 = sshll.u32 (!%p198_p9), %s338_s12, 4  ;;  %s343_s15 = int_to_ptr.hbm [resolvable:$true] %s342_s15 }
   0xf   : > { %s483_s17 = sshra.s32 (!%p198_p9), %s343_s15, 4  ;;  %s484_s17 = int_to_ptr.hbm [resolvable:$true] %s483_s17 }
  0x10   : > { %s485_s23 = scalar_lea.hbm (!%p198_p9), %s484_s17, 1  ;;  %p490_p0 = scmp.lt.s32.totalorder (!%p198_p9), %s484_s17, %s683_s5 }
  0x11   : > { %p486_p11 = scmp.ne.s32.totalorder (!%p198_p9), %s484_s17, %s485_s23 }
  0x13   : > { %v235_v0 = vld [vmem:[%s681_s3] sm:$0xff]  ;;  %v533_v1 = vmov 0   ;;  %s620_s9 = scalar_select %p226_p10, %s585_s22, 1  ;;  %vm250_vm0 = vcmask 261120   ;;  %v234_v5 = vld [vmem:[%s680_s2 + $0x8] sm:$0xff]  ;;  %vm297_vm1 = vcmask 64512  }
  0x14   : > { %457 = vset.pattern.permute.xlu0 %v533_v1  ;;  %458 = vset.pattern.permute.xlu1 %v533_v1  ;;  %v237_v2 = vld [vmem:[%s682_s4] sm:$0xff]  ;;  %v236_v6 = vld [vmem:[%s681_s3 + $0x8] sm:$0xff]  ;;  %vm307_vm2 = vcmask 57344   ;;  %p487_p12 = pnand %p486_p11, %p602_p5  ;;  %s489_s22 = scalar_lea.hbm %s683_s5, 2 }
  0x15   : > { %242 = vperm.xlu0 %457, %v235_v0   ;;  %287 = vperm.xlu1 %458, %v237_v2   ;;  %s410_s10 = sshll.u32 %s620_s9, 3  ;;  %v233_v4 = vld [vmem:[%s680_s2] sm:$0xff]  ;;  %v238_v7 = vld [vmem:[%s682_s4 + $0x8] sm:$0xff]  ;;  %s232_s8 = scalar_lea.vmem %s679_s1, %s620_s9 }
  0x16   : > { %s229_s13 = scalar_lea.vmem %s678_s0, %s410_s10  ;;  %v310_v24 = vld [vmem:[%s232_s8] sm:$0x1]  ;;  %s224_s9 = sand.u32 1, %s523_s19  }
  0x17   : > { %v239_v3 = vld [vmem:[%s229_s13] sm:$0xff]  ;;  %v312_v26 = vmax.f32 %v310_v24, 1e-30  ;;  %vm311_vm3 = vcmp.gt.f32.partialorder %v310_v24, 0.0  ;;  %s225_s13 = scalar_lea.vmem [#allocation3], %s224_s9  ;;  %s330_s16 = scalar_lea.sflag [#allocation4], %s224_s9 }
  0x18   : > { %411 = vmatpush.xpose.msk.msra.mxu0 %vm250_vm0, %v239_v3  ;;  %416 = vmatpush.xpose.msk.msra.mxu1 %vm250_vm0, %v239_v3  ;;  %s340_s14 = sshll.u32 %s225_s13, 4  ;;  %p488_p13 = pneg %p487_p12  ;;  %s341_s14 = int_to_ptr.vmem [resolvable:$true] %s340_s14 }
  0x19   : > { %p491_p1 = scmp.lt.s32.totalorder %s489_s22, %s485_s23 }
  0x1b   : > { %412 = vmatmul.msk.f32.vlgmr.msra.gmra.mxu0 %vm250_vm0, %v233_v4  ;;  %413 = vmatmul.msk.f32.vlgmr.msra.gmra.mxu1 %vm250_vm0, %v234_v5  ;;  %p492_p2 = por %p491_p1, %p490_p0 }
  0x1d   : > { %247 = vperm.xlu0 %457, %v236_v6   ;;  %292 = vperm.xlu1 %458, %v238_v7   ;;  %p493_p3 = pnand %p492_p2, %p488_p13 }
  0x87   : > { %v243_v8 = vpop.permute.xlu0 %242  ;;  %v288_v10 = vpop.permute.xlu1 %287 }
  0x8f   : > { %v248_v9 = vpop.permute.xlu0 %247  ;;  %v293_v17 = vpop.permute.xlu1 %292 }
  0x98   : > { %v277_v11 = vpop.f32.mrf.mxu0  ;;  %v280_v12 = vpop.f32.mrf.mxu1 }
  0x99   : > { %v278_v13 = vadd.f32 %v277_v11, %v243_v8  ;;  %v281_v14 = vadd.f32 %v280_v12, %v248_v9 }
  0x9b   : > { %459 = vtanh.f32 %v278_v13 }
  0x9c   : > { %461 = vtanh.f32 %v281_v14 }
  0x9d   : > { %463 = vlog2.f32 %v312_v26 }
  0xa1   : > { %v460_v15 = vpop.eup %459 }
  0xa2   : > { %v462_v16 = vpop.eup %461  ;;  %v295_v18 = vmul.f32 %v460_v15, %v288_v10 }
  0xa3   : > { %v296_v19 = vmul.f32 %v462_v16, %v293_v17  ;;  %v464_v31 = vpop.eup %463 }
  0xa4   : > { %v298_v20 = vsel %vm297_vm1, %v295_v18, 0.0  ;;  %v314_v32 = vmul.f32 0.6931472, %v464_v31 }
  0xa5   : > { %v299_v21 = vsel %vm297_vm1, %v296_v19, 0.0 }
  0xa6   : > { %v300_v22 = vadd.f32 %v299_v21, %v298_v20 }
  0xa8   : > { %v301_v23 = vrot.slane %v300_v22, 4 }
  0xaa   : > { %v302_v25 = vadd.f32 %v301_v23, %v300_v22 }
  0xac   : > { %v303_v27 = vrot.slane %v302_v25, 2 }
  0xae   : > { %v304_v28 = vadd.f32 %v303_v27, %v302_v25 }
  0xb0   : > { %v305_v29 = vrot.slane %v304_v28, 1 }
  0xb2   : > { %v306_v30 = vadd.f32 %v305_v29, %v304_v28 }
  0xb4   : > { %308 = vst.msk [vmem:[#allocation2] sm:$0x1] %vm307_vm2, %v306_v30 }
  0xbb   : > { %v309_v33 = vld [vmem:[#allocation2] sm:$0x1] }
  0xbc   : > { %v315_v34 = vadd.f32 %v314_v32, %v309_v33 }
  0xbe   : > { %v316_v35 = vsel %vm311_vm3, %v315_v34, -1e+30 }
  0xbf   : > { %v317_v36 = vsel %vm307_vm2, %v316_v35, -inf }
  0xc0   : > { %318 = vmax.xlane.f32.xlu2 %v317_v36 }
 0x133   : > { %v319_v37 = vpop.xlane.xlu2 %318 }
 0x134   : > { %v320_v38 = vsub.f32 %v316_v35, %v319_v37 }
 0x136   : > { %v321_v39 = vmul.f32 1.442695, %v320_v38 }
 0x138   : > { %465 = vpow2.f32 %v321_v39 }
 0x13e   : > { %v466_v40 = vpop.eup %465 }
 0x13f   : > { %v323_v41 = vsel %vm307_vm2, %v466_v40, 0.0 }
 0x140   : > { %324 = vadd.xlane.f32.xlu2 %v323_v41 }
 0x1b3   : > { %v325_v42 = vpop.xlane.xlu2 %324 }
 0x1b4   : > { %467 = vrcp.f32 %v325_v42 }
 0x1ba   : > { %v468_v43 = vpop.eup %467 }
 0x1bb   : > { %v327_v44 = vmul.f32 %v468_v43, %v466_v40 }
 0x1bd   : > { %328 = vst.msk [vmem:[%s225_s13] sm:$0x1] %vm307_vm2, %v327_v44 }
 0x1be   : > { %496 = shalt.err (!%p493_p3)
}
 0x1bf   : > { %417 = dma.vmem_to_hbm [thread:$0]  (%p602_p5), %s341_s14, 16, %s343_s15, %s330_s16  }
 0x1c0 PF: > { %p423_p4 = scmp.ge.s32.totalorder %s531_s21, 2  ;;  %s354_s7 = sand.u32 1, %s519_s18  }
 0x1c1   : > { %s355_s8 = scalar_lea.sflag [#allocation4], %s354_s7 }
 0x1c2   : > { %p420_p7 = pnand %p423_p4, %p606_p6 }
 0x1c4   : > { %p421_p8 = pneg %p420_p7 }
 0x1c6   : > { %514 = dma.done.wait (%p421_p8), %s355_s8, 16  }
 0x1c7   : > { %516 = vsyncadd (%p421_p8), %s355_s8, 4294967280  ;;  %p15_p9 = scmp.ge.s32.totalorder %s589_s24, 4   ;;  %s686_s18 = smov %s523_s19 }
 0x1c8   : > { %s687_s19 = smov %s527_s20  ;;  %s688_s20 = smov %s600_s27 }
 0x1c9   : > { %s689_s21 = smov %s589_s24  ;;  %17 = sbr.rel (!%p15_p9) target bundleno = 3 (0x3), region = 78 }
 0x1ce   :  { %360 = vsyncpa [#allocation4], 1 }
 0x1cf   :  { %362 = vsyncpa [#allocation4 + $0x1], 1 }

</bundles_post_ra>
